<compile_context>
chip_gen: v7x
topology: tpu7x:2x2x1
jax: 0.10.0
libtpu: 0.0.40
codegen_flags: <defaults>
</compile_context>

<pallas_src>
import numpy as np
import jax
import jax.numpy as jnp
from jax.experimental import pallas as pl
from jax.experimental.pallas import tpu as pltpu


def _conv3x3s2_relu_kernel(xee_ref, xeeh_ref, xeo_ref, xeoh_ref, xoe_ref, xoo_ref,
                           w_ref, b_ref, o_ref):
    """One (batch, output-row-tile) grid step: 9 accumulated matmuls + bias + ReLU.

    Parity planes (padded input xp, output row ho = tile_start + t):
      xee[t] = xp[2*ho,   even cols]   xeo[t] = xp[2*ho,   odd cols]
      xoe[t] = xp[2*ho+1, even cols]   xoo[t] = xp[2*ho+1, odd cols]
    xeeh/xeoh hold the +1 halo row (xp row 2*(tile_start+TH)) for the bottom tap.
    w_ref[i, j][ci, co] == torch weight[co, ci, i, j];  b_ref: [1, Cout] f32.
    """
    TH = o_ref.shape[1]
    Wo = o_ref.shape[2]
    C = xee_ref.shape[3]
    Cout = o_ref.shape[3]

    ee = xee_ref[0]                      # [TH, Wo+1, C]  rows 2*ho,   even cols
    eo = xeo_ref[0]                      # [TH, Wo+1, C]  rows 2*ho,   odd  cols
    oe = xoe_ref[0]                      # [TH, Wo+1, C]  rows 2*ho+1, even cols
    oo = xoo_ref[0]                      # [TH, Wo+1, C]  rows 2*ho+1, odd  cols
    if TH > 1:                           # rows 2*ho+2 = even rows shifted by one + halo row
        ee1 = jnp.concatenate([ee[1:], xeeh_ref[0]], axis=0)
        eo1 = jnp.concatenate([eo[1:], xeoh_ref[0]], axis=0)
    else:
        ee1 = xeeh_ref[0]
        eo1 = xeoh_ref[0]

    # (kernel row i, kernel col j) -> (parity plane, column offset within the plane)
    taps = (
        (0, 0, ee, 0), (0, 1, eo, 0), (0, 2, ee, 1),
        (1, 0, oe, 0), (1, 1, oo, 0), (1, 2, oe, 1),
        (2, 0, ee1, 0), (2, 1, eo1, 0), (2, 2, ee1, 1),
    )

    # f32 accumulator with bias folded in; ReLU + single cast at the store.
    acc = jnp.broadcast_to(b_ref[...].astype(jnp.float32), (TH * Wo, Cout))
    for i, j, plane, off in taps:
        patch = plane[:, off:off + Wo, :].reshape(TH * Wo, C)      # [tm, C]
        acc = acc + jnp.dot(patch, w_ref[i, j],                    # [C, Cout]
                            preferred_element_type=jnp.float32)

    o_ref[0] = jnp.maximum(acc, 0.0).reshape(TH, Wo, Cout).astype(o_ref.dtype)


def _largest_divisor_leq(n, target):
    t = int(max(1, min(n, target)))
    while n % t:
        t -= 1
    return t


def downsample_block(x, weight, bias, *, row_tile=8, compute_dtype=None,
                     vmem_limit_bytes=32 * 1024 * 1024):
    """ReLU(Conv2d(x; kernel=3, stride=2, padding=1)).

    x: [B, C, H, W] (NCHW, like PyTorch); weight: [Cout, C, 3, 3]; bias: [Cout].
    compute_dtype: e.g. jnp.bfloat16 for the v6e/v7x MXU path (accumulation stays f32).
    Returns NCHW [B, Cout, H//2, W//2].
    """
    B, C, H, W = x.shape
    Cout = weight.shape[0]
    assert weight.shape == (Cout, C, 3, 3) and bias.shape == (Cout,)
    # TODO(synk): generalize tiling to odd H/W (PyTorch supports them); VAE inputs are even.
    assert H % 2 == 0 and W % 2 == 0, "this kernel assumes even spatial sizes"
    Ho, Wo = H // 2, W // 2
    Woe = Wo + 1

    cdt = jnp.dtype(compute_dtype) if compute_dtype is not None else x.dtype

    # NCHW -> NHWC + zero-pad 1 on each spatial side (the conv padding). Pure layout ops.
    xp = jnp.pad(jnp.transpose(x, (0, 2, 3, 1)).astype(cdt),
                 ((0, 0), (1, 1), (1, 1), (0, 0)))                 # [B, H+2, W+2, C]
    # 2x2 spatial-parity split: makes every stride-2 tap a contiguous in-kernel slice.
    x_ee = xp[:, 0:2 * Ho + 1:2, 0:2 * Wo + 1:2, :]                # [B, Ho+1, Woe, C]
    x_eo = xp[:, 0:2 * Ho + 1:2, 1:2 * Wo + 2:2, :]                # [B, Ho+1, Woe, C]
    x_oe = xp[:, 1:2 * Ho:2,     0:2 * Wo + 1:2, :]                # [B, Ho,   Woe, C]
    x_oo = xp[:, 1:2 * Ho:2,     1:2 * Wo + 2:2, :]                # [B, Ho,   Woe, C]

    # w_taps[i, j, ci, co] == weight[co, ci, i, j]
    w_taps = jnp.transpose(weight, (2, 3, 1, 0)).astype(cdt)       # [3, 3, C, Cout]
    b2d = bias.reshape(1, Cout).astype(jnp.float32)

    TH = _largest_divisor_leq(Ho, row_tile)                        # output rows per tile
    grid = (B, Ho // TH)

    def main_map(b, m):
        return (b, m, 0, 0)

    def halo_map(b, m):        # 1-row block => block index == element row offset
        return (b, TH * (m + 1), 0, 0)

    plane_spec = pl.BlockSpec((1, TH, Woe, C), main_map)
    halo_spec = pl.BlockSpec((1, 1, Woe, C), halo_map)

    itemsize = jnp.dtype(cdt).itemsize
    cost = pl.CostEstimate(
        flops=2 * B * Ho * Wo * Cout * C * 9,
        transcendentals=0,
        bytes_accessed=(B * (H + 2) * (W + 2) * C + 9 * C * Cout) * itemsize
        + Cout * 4 + B * Ho * Wo * Cout * jnp.dtype(x.dtype).itemsize,
    )

    out_nhwc = pl.pallas_call(
        _conv3x3s2_relu_kernel,
        out_shape=jax.ShapeDtypeStruct((B, Ho, Wo, Cout), x.dtype),
        grid=grid,
        in_specs=[
            plane_spec,                                            # x_ee  (rows 2*ho)
            halo_spec,                                             # x_ee  +1-row halo
            plane_spec,                                            # x_eo
            halo_spec,                                             # x_eo  +1-row halo
            plane_spec,                                            # x_oe  (rows 2*ho+1)
            plane_spec,                                            # x_oo
            pl.BlockSpec((3, 3, C, Cout), lambda b, m: (0, 0, 0, 0)),  # weights (resident)
            pl.BlockSpec((1, Cout), lambda b, m: (0, 0)),              # bias    (resident)
        ],
        out_specs=pl.BlockSpec((1, TH, Wo, Cout), main_map),
        compiler_params=pltpu.CompilerParams(
            dimension_semantics=("parallel", "parallel"),   # v7x: shard across both TCs
            vmem_limit_bytes=vmem_limit_bytes,              # fits v5e/v6e/v7x physical VMEM
        ),
        cost_estimate=cost,
    )(x_ee, x_ee, x_eo, x_eo, x_oe, x_oo, w_taps, b2d)

    # Module semantics are NCHW; drop this transpose if the consumer takes NHWC directly.
    return jnp.transpose(out_nhwc, (0, 3, 1, 2))


if __name__ == "__main__":
    key = jax.random.PRNGKey(0)
    B, C, H, W = 2, 4, 16, 16
    kx, kw, kb = jax.random.split(key, 3)

    x = jax.random.normal(kx, (B, C, H, W), dtype=jnp.float32)
    fan_in = C * 3 * 3
    bound = 1.0 / np.sqrt(fan_in)
    weight = jax.random.uniform(kw, (C, C, 3, 3), jnp.float32, -bound, bound)
    bias = jax.random.uniform(kb, (C,), jnp.float32, -bound, bound)

    # Reference: XLA conv + bias + ReLU (same semantics as the PyTorch module).
    ref = jax.lax.conv_general_dilated(
        x, weight, window_strides=(2, 2), padding=((1, 1), (1, 1)),
        dimension_numbers=("NCHW", "OIHW", "NCHW"),
    ) + bias.reshape(1, C, 1, 1)
    ref = np.asarray(jnp.maximum(ref, 0.0))

    # Multi-tile grid (exercises the halo path): grid = (B=2, row tiles=2).
    out = jax.block_until_ready(downsample_block(x, weight, bias, row_tile=4))
    assert out.shape == (B, C, H // 2, W // 2), out.shape
    np.testing.assert_allclose(np.asarray(out), ref, rtol=1e-5, atol=1e-5)

    # Full-image row tile (grid = (2, 1)).
    out_full = jax.block_until_ready(downsample_block(x, weight, bias, row_tile=8))
    np.testing.assert_allclose(np.asarray(out_full), ref, rtol=1e-5, atol=1e-5)

    # bf16 compute path (v6e/v7x MXU), f32 accumulation/epilogue -- looser tolerance.
    out_bf16 = jax.block_until_ready(
        downsample_block(x, weight, bias, row_tile=4, compute_dtype=jnp.bfloat16))
    np.testing.assert_allclose(np.asarray(out_bf16), ref, rtol=5e-2, atol=5e-2)

    print("KERNEL_OK")
</pallas_src>

<mosaic_0001>
module attributes {stable_mosaic.version = 11 : i64} {
  func.func @_conv3x3s2_relu_kernel(%arg0: i32, %arg1: i32, %arg2: memref<1x4x9x4xf32, #tpu.memory_space<vmem>>, %arg3: memref<1x1x9x4xf32, #tpu.memory_space<vmem>>, %arg4: memref<1x4x9x4xf32, #tpu.memory_space<vmem>>, %arg5: memref<1x1x9x4xf32, #tpu.memory_space<vmem>>, %arg6: memref<1x4x9x4xf32, #tpu.memory_space<vmem>>, %arg7: memref<1x4x9x4xf32, #tpu.memory_space<vmem>>, %arg8: memref<3x3x4x4xf32, #tpu.memory_space<vmem>>, %arg9: memref<1x4xf32, #tpu.memory_space<vmem>>, %arg10: memref<1x4x8x4xf32, #tpu.memory_space<vmem>>) attributes {dimension_semantics = [#tpu.dimension_semantics<parallel>, #tpu.dimension_semantics<parallel>], iteration_bounds = array<i64: 2, 2>, scalar_prefetch = 0 : i64, scratch_operands = 0 : i64, tpu.core_type = #tpu.core_type<tc>, window_params = [{transform_indices = @transform_0, window_bounds = array<i64: 1, 4, 9, 4>}, {transform_indices = @transform_1, window_bounds = array<i64: 1, 1, 9, 4>}, {transform_indices = @transform_2, window_bounds = array<i64: 1, 4, 9, 4>}, {transform_indices = @transform_3, window_bounds = array<i64: 1, 1, 9, 4>}, {transform_indices = @transform_4, window_bounds = array<i64: 1, 4, 9, 4>}, {transform_indices = @transform_5, window_bounds = array<i64: 1, 4, 9, 4>}, {pipeline_mode = #tpu.pipeline_mode<synchronous>, transform_indices = @transform_6, window_bounds = array<i64: 3, 3, 4, 4>}, {pipeline_mode = #tpu.pipeline_mode<synchronous>, transform_indices = @transform_7, window_bounds = array<i64: 1, 4>}, {transform_indices = @transform_8, window_bounds = array<i64: 1, 4, 8, 4>}]} {
    %c0 = arith.constant 0 : index
    %c0_0 = arith.constant 0 : index
    %c0_1 = arith.constant 0 : index
    %c0_2 = arith.constant 0 : index
    %0 = vector.load %arg2[%c0, %c0_0, %c0_1, %c0_2] : memref<1x4x9x4xf32, #tpu.memory_space<vmem>>, vector<1x4x9x4xf32>
    %1 = vector.shape_cast %0 : vector<1x4x9x4xf32> to vector<4x9x4xf32>
    %c0_3 = arith.constant 0 : index
    %c0_4 = arith.constant 0 : index
    %c0_5 = arith.constant 0 : index
    %c0_6 = arith.constant 0 : index
    %2 = vector.load %arg4[%c0_3, %c0_4, %c0_5, %c0_6] : memref<1x4x9x4xf32, #tpu.memory_space<vmem>>, vector<1x4x9x4xf32>
    %3 = vector.shape_cast %2 : vector<1x4x9x4xf32> to vector<4x9x4xf32>
    %c0_7 = arith.constant 0 : index
    %c0_8 = arith.constant 0 : index
    %c0_9 = arith.constant 0 : index
    %c0_10 = arith.constant 0 : index
    %4 = vector.load %arg6[%c0_7, %c0_8, %c0_9, %c0_10] : memref<1x4x9x4xf32, #tpu.memory_space<vmem>>, vector<1x4x9x4xf32>
    %5 = vector.shape_cast %4 : vector<1x4x9x4xf32> to vector<4x9x4xf32>
    %c0_11 = arith.constant 0 : index
    %c0_12 = arith.constant 0 : index
    %c0_13 = arith.constant 0 : index
    %c0_14 = arith.constant 0 : index
    %6 = vector.load %arg7[%c0_11, %c0_12, %c0_13, %c0_14] : memref<1x4x9x4xf32, #tpu.memory_space<vmem>>, vector<1x4x9x4xf32>
    %7 = vector.shape_cast %6 : vector<1x4x9x4xf32> to vector<4x9x4xf32>
    %8 = vector.extract_strided_slice %1 {offsets = [1, 0, 0], sizes = [3, 9, 4], strides = [1, 1, 1]} : vector<4x9x4xf32> to vector<3x9x4xf32>
    %c0_15 = arith.constant 0 : index
    %c0_16 = arith.constant 0 : index
    %c0_17 = arith.constant 0 : index
    %c0_18 = arith.constant 0 : index
    %9 = vector.load %arg3[%c0_15, %c0_16, %c0_17, %c0_18] : memref<1x1x9x4xf32, #tpu.memory_space<vmem>>, vector<1x1x9x4xf32>
    %10 = vector.shape_cast %9 : vector<1x1x9x4xf32> to vector<1x9x4xf32>
    %11 = tpu.concatenate %8, %10 in 0 : vector<3x9x4xf32>, vector<1x9x4xf32> -> vector<4x9x4xf32>
    %12 = vector.extract_strided_slice %3 {offsets = [1, 0, 0], sizes = [3, 9, 4], strides = [1, 1, 1]} : vector<4x9x4xf32> to vector<3x9x4xf32>
    %c0_19 = arith.constant 0 : index
    %c0_20 = arith.constant 0 : index
    %c0_21 = arith.constant 0 : index
    %c0_22 = arith.constant 0 : index
    %13 = vector.load %arg5[%c0_19, %c0_20, %c0_21, %c0_22] : memref<1x1x9x4xf32, #tpu.memory_space<vmem>>, vector<1x1x9x4xf32>
    %14 = vector.shape_cast %13 : vector<1x1x9x4xf32> to vector<1x9x4xf32>
    %15 = tpu.concatenate %12, %14 in 0 : vector<3x9x4xf32>, vector<1x9x4xf32> -> vector<4x9x4xf32>
    %c0_23 = arith.constant 0 : index
    %c0_24 = arith.constant 0 : index
    %16 = vector.load %arg9[%c0_23, %c0_24] : memref<1x4xf32, #tpu.memory_space<vmem>>, vector<1x4xf32>
    %17 = vector.shape_cast %16 : vector<1x4xf32> to vector<1x4xf32>
    %18 = vector.broadcast %17 : vector<1x4xf32> to vector<32x4xf32>
    %19 = vector.extract_strided_slice %1 {offsets = [0, 0, 0], sizes = [4, 8, 4], strides = [1, 1, 1]} : vector<4x9x4xf32> to vector<4x8x4xf32>
    %20 = vector.shape_cast %19 : vector<4x8x4xf32> to vector<32x4xf32>
    %c0_25 = arith.constant 0 : index
    %c0_26 = arith.constant 0 : index
    %c0_27 = arith.constant 0 : index
    %c0_28 = arith.constant 0 : index
    %21 = vector.load %arg8[%c0_25, %c0_26, %c0_27, %c0_28] : memref<3x3x4x4xf32, #tpu.memory_space<vmem>>, vector<1x1x4x4xf32>
    %22 = vector.shape_cast %21 : vector<1x1x4x4xf32> to vector<4x4xf32>
    %cst = arith.constant dense<0.000000e+00> : vector<32x4xf32>
    %23 = tpu.matmul %20, %22, %cst {dimension_numbers = #tpu.dot_dimension_numbers<[1], [0], [0], [1], [0, 0, 1, 1], [], []>} : vector<32x4xf32>, vector<4x4xf32>, vector<32x4xf32> -> vector<32x4xf32>
    %24 = arith.addf %18, %23 : vector<32x4xf32>
    %25 = vector.extract_strided_slice %3 {offsets = [0, 0, 0], sizes = [4, 8, 4], strides = [1, 1, 1]} : vector<4x9x4xf32> to vector<4x8x4xf32>
    %26 = vector.shape_cast %25 : vector<4x8x4xf32> to vector<32x4xf32>
    %c0_29 = arith.constant 0 : index
    %c1 = arith.constant 1 : index
    %c0_30 = arith.constant 0 : index
    %c0_31 = arith.constant 0 : index
    %27 = vector.load %arg8[%c0_29, %c1, %c0_30, %c0_31] : memref<3x3x4x4xf32, #tpu.memory_space<vmem>>, vector<1x1x4x4xf32>
    %28 = vector.shape_cast %27 : vector<1x1x4x4xf32> to vector<4x4xf32>
    %cst_32 = arith.constant dense<0.000000e+00> : vector<32x4xf32>
    %29 = tpu.matmul %26, %28, %cst_32 {dimension_numbers = #tpu.dot_dimension_numbers<[1], [0], [0], [1], [0, 0, 1, 1], [], []>} : vector<32x4xf32>, vector<4x4xf32>, vector<32x4xf32> -> vector<32x4xf32>
    %30 = arith.addf %24, %29 : vector<32x4xf32>
    %31 = vector.extract_strided_slice %1 {offsets = [0, 1, 0], sizes = [4, 8, 4], strides = [1, 1, 1]} : vector<4x9x4xf32> to vector<4x8x4xf32>
    %32 = vector.shape_cast %31 : vector<4x8x4xf32> to vector<32x4xf32>
    %c0_33 = arith.constant 0 : index
    %c2 = arith.constant 2 : index
    %c0_34 = arith.constant 0 : index
    %c0_35 = arith.constant 0 : index
    %33 = vector.load %arg8[%c0_33, %c2, %c0_34, %c0_35] : memref<3x3x4x4xf32, #tpu.memory_space<vmem>>, vector<1x1x4x4xf32>
    %34 = vector.shape_cast %33 : vector<1x1x4x4xf32> to vector<4x4xf32>
    %cst_36 = arith.constant dense<0.000000e+00> : vector<32x4xf32>
    %35 = tpu.matmul %32, %34, %cst_36 {dimension_numbers = #tpu.dot_dimension_numbers<[1], [0], [0], [1], [0, 0, 1, 1], [], []>} : vector<32x4xf32>, vector<4x4xf32>, vector<32x4xf32> -> vector<32x4xf32>
    %36 = arith.addf %30, %35 : vector<32x4xf32>
    %37 = vector.extract_strided_slice %5 {offsets = [0, 0, 0], sizes = [4, 8, 4], strides = [1, 1, 1]} : vector<4x9x4xf32> to vector<4x8x4xf32>
    %38 = vector.shape_cast %37 : vector<4x8x4xf32> to vector<32x4xf32>
    %c1_37 = arith.constant 1 : index
    %c0_38 = arith.constant 0 : index
    %c0_39 = arith.constant 0 : index
    %c0_40 = arith.constant 0 : index
    %39 = vector.load %arg8[%c1_37, %c0_38, %c0_39, %c0_40] : memref<3x3x4x4xf32, #tpu.memory_space<vmem>>, vector<1x1x4x4xf32>
    %40 = vector.shape_cast %39 : vector<1x1x4x4xf32> to vector<4x4xf32>
    %cst_41 = arith.constant dense<0.000000e+00> : vector<32x4xf32>
    %41 = tpu.matmul %38, %40, %cst_41 {dimension_numbers = #tpu.dot_dimension_numbers<[1], [0], [0], [1], [0, 0, 1, 1], [], []>} : vector<32x4xf32>, vector<4x4xf32>, vector<32x4xf32> -> vector<32x4xf32>
    %42 = arith.addf %36, %41 : vector<32x4xf32>
    %43 = vector.extract_strided_slice %7 {offsets = [0, 0, 0], sizes = [4, 8, 4], strides = [1, 1, 1]} : vector<4x9x4xf32> to vector<4x8x4xf32>
    %44 = vector.shape_cast %43 : vector<4x8x4xf32> to vector<32x4xf32>
    %c1_42 = arith.constant 1 : index
    %c1_43 = arith.constant 1 : index
    %c0_44 = arith.constant 0 : index
    %c0_45 = arith.constant 0 : index
    %45 = vector.load %arg8[%c1_42, %c1_43, %c0_44, %c0_45] : memref<3x3x4x4xf32, #tpu.memory_space<vmem>>, vector<1x1x4x4xf32>
    %46 = vector.shape_cast %45 : vector<1x1x4x4xf32> to vector<4x4xf32>
    %cst_46 = arith.constant dense<0.000000e+00> : vector<32x4xf32>
    %47 = tpu.matmul %44, %46, %cst_46 {dimension_numbers = #tpu.dot_dimension_numbers<[1], [0], [0], [1], [0, 0, 1, 1], [], []>} : vector<32x4xf32>, vector<4x4xf32>, vector<32x4xf32> -> vector<32x4xf32>
    %48 = arith.addf %42, %47 : vector<32x4xf32>
    %49 = vector.extract_strided_slice %5 {offsets = [0, 1, 0], sizes = [4, 8, 4], strides = [1, 1, 1]} : vector<4x9x4xf32> to vector<4x8x4xf32>
    %50 = vector.shape_cast %49 : vector<4x8x4xf32> to vector<32x4xf32>
    %c1_47 = arith.constant 1 : index
    %c2_48 = arith.constant 2 : index
    %c0_49 = arith.constant 0 : index
    %c0_50 = arith.constant 0 : index
    %51 = vector.load %arg8[%c1_47, %c2_48, %c0_49, %c0_50] : memref<3x3x4x4xf32, #tpu.memory_space<vmem>>, vector<1x1x4x4xf32>
    %52 = vector.shape_cast %51 : vector<1x1x4x4xf32> to vector<4x4xf32>
    %cst_51 = arith.constant dense<0.000000e+00> : vector<32x4xf32>
    %53 = tpu.matmul %50, %52, %cst_51 {dimension_numbers = #tpu.dot_dimension_numbers<[1], [0], [0], [1], [0, 0, 1, 1], [], []>} : vector<32x4xf32>, vector<4x4xf32>, vector<32x4xf32> -> vector<32x4xf32>
    %54 = arith.addf %48, %53 : vector<32x4xf32>
    %55 = vector.extract_strided_slice %11 {offsets = [0, 0, 0], sizes = [4, 8, 4], strides = [1, 1, 1]} : vector<4x9x4xf32> to vector<4x8x4xf32>
    %56 = vector.shape_cast %55 : vector<4x8x4xf32> to vector<32x4xf32>
    %c2_52 = arith.constant 2 : index
    %c0_53 = arith.constant 0 : index
    %c0_54 = arith.constant 0 : index
    %c0_55 = arith.constant 0 : index
    %57 = vector.load %arg8[%c2_52, %c0_53, %c0_54, %c0_55] : memref<3x3x4x4xf32, #tpu.memory_space<vmem>>, vector<1x1x4x4xf32>
    %58 = vector.shape_cast %57 : vector<1x1x4x4xf32> to vector<4x4xf32>
    %cst_56 = arith.constant dense<0.000000e+00> : vector<32x4xf32>
    %59 = tpu.matmul %56, %58, %cst_56 {dimension_numbers = #tpu.dot_dimension_numbers<[1], [0], [0], [1], [0, 0, 1, 1], [], []>} : vector<32x4xf32>, vector<4x4xf32>, vector<32x4xf32> -> vector<32x4xf32>
    %60 = arith.addf %54, %59 : vector<32x4xf32>
    %61 = vector.extract_strided_slice %15 {offsets = [0, 0, 0], sizes = [4, 8, 4], strides = [1, 1, 1]} : vector<4x9x4xf32> to vector<4x8x4xf32>
    %62 = vector.shape_cast %61 : vector<4x8x4xf32> to vector<32x4xf32>
    %c2_57 = arith.constant 2 : index
    %c1_58 = arith.constant 1 : index
    %c0_59 = arith.constant 0 : index
    %c0_60 = arith.constant 0 : index
    %63 = vector.load %arg8[%c2_57, %c1_58, %c0_59, %c0_60] : memref<3x3x4x4xf32, #tpu.memory_space<vmem>>, vector<1x1x4x4xf32>
    %64 = vector.shape_cast %63 : vector<1x1x4x4xf32> to vector<4x4xf32>
    %cst_61 = arith.constant dense<0.000000e+00> : vector<32x4xf32>
    %65 = tpu.matmul %62, %64, %cst_61 {dimension_numbers = #tpu.dot_dimension_numbers<[1], [0], [0], [1], [0, 0, 1, 1], [], []>} : vector<32x4xf32>, vector<4x4xf32>, vector<32x4xf32> -> vector<32x4xf32>
    %66 = arith.addf %60, %65 : vector<32x4xf32>
    %67 = vector.extract_strided_slice %11 {offsets = [0, 1, 0], sizes = [4, 8, 4], strides = [1, 1, 1]} : vector<4x9x4xf32> to vector<4x8x4xf32>
    %68 = vector.shape_cast %67 : vector<4x8x4xf32> to vector<32x4xf32>
    %c2_62 = arith.constant 2 : index
    %c2_63 = arith.constant 2 : index
    %c0_64 = arith.constant 0 : index
    %c0_65 = arith.constant 0 : index
    %69 = vector.load %arg8[%c2_62, %c2_63, %c0_64, %c0_65] : memref<3x3x4x4xf32, #tpu.memory_space<vmem>>, vector<1x1x4x4xf32>
    %70 = vector.shape_cast %69 : vector<1x1x4x4xf32> to vector<4x4xf32>
    %cst_66 = arith.constant dense<0.000000e+00> : vector<32x4xf32>
    %71 = tpu.matmul %68, %70, %cst_66 {dimension_numbers = #tpu.dot_dimension_numbers<[1], [0], [0], [1], [0, 0, 1, 1], [], []>} : vector<32x4xf32>, vector<4x4xf32>, vector<32x4xf32> -> vector<32x4xf32>
    %72 = arith.addf %66, %71 : vector<32x4xf32>
    %cst_67 = arith.constant 0.000000e+00 : f32
    %73 = vector.broadcast %cst_67 : f32 to vector<32x4xf32>
    %74 = arith.maximumf %72, %73 : vector<32x4xf32>
    %75 = vector.shape_cast %74 : vector<32x4xf32> to vector<4x8x4xf32>
    %c0_68 = arith.constant 0 : index
    %c0_69 = arith.constant 0 : index
    %c0_70 = arith.constant 0 : index
    %c0_71 = arith.constant 0 : index
    %76 = vector.load %arg10[%c0_68, %c0_69, %c0_70, %c0_71] : memref<1x4x8x4xf32, #tpu.memory_space<vmem>>, vector<1x4x8x4xf32>
    %77 = vector.shape_cast %76 : vector<1x4x8x4xf32> to vector<4x8x4xf32>
    %78 = vector.shape_cast %75 : vector<4x8x4xf32> to vector<1x4x8x4xf32>
    tpu.vector_store %arg10[%c0_68, %c0_69, %c0_70, %c0_71], %78 {strides = array<i32>} : memref<1x4x8x4xf32, #tpu.memory_space<vmem>>, vector<1x4x8x4xf32>,
    return
  }
  func.func @transform_0(%arg0: i32, %arg1: i32) -> (i32, i32, i32, i32) {
    %c0_i32 = arith.constant 0 : i32
    %c0_i32_0 = arith.constant 0 : i32
    %c0_i32_1 = arith.constant 0 : i32
    return %arg0, %arg1, %c0_i32, %c0_i32_0 : i32, i32, i32, i32
  }
  func.func @transform_1(%arg0: i32, %arg1: i32) -> (i32, i32, i32, i32) {
    %c1_i32 = arith.constant 1 : i32
    %0 = arith.addi %arg1, %c1_i32 : i32
    %c4_i32 = arith.constant 4 : i32
    %1 = arith.muli %c4_i32, %0 : i32
    %c0_i32 = arith.constant 0 : i32
    %c0_i32_0 = arith.constant 0 : i32
    %c0_i32_1 = arith.constant 0 : i32
    return %arg0, %1, %c0_i32, %c0_i32_0 : i32, i32, i32, i32
  }
  func.func @transform_2(%arg0: i32, %arg1: i32) -> (i32, i32, i32, i32) {
    %c0_i32 = arith.constant 0 : i32
    %c0_i32_0 = arith.constant 0 : i32
    %c0_i32_1 = arith.constant 0 : i32
    return %arg0, %arg1, %c0_i32, %c0_i32_0 : i32, i32, i32, i32
  }
  func.func @transform_3(%arg0: i32, %arg1: i32) -> (i32, i32, i32, i32) {
    %c1_i32 = arith.constant 1 : i32
    %0 = arith.addi %arg1, %c1_i32 : i32
    %c4_i32 = arith.constant 4 : i32
    %1 = arith.muli %c4_i32, %0 : i32
    %c0_i32 = arith.constant 0 : i32
    %c0_i32_0 = arith.constant 0 : i32
    %c0_i32_1 = arith.constant 0 : i32
    return %arg0, %1, %c0_i32, %c0_i32_0 : i32, i32, i32, i32
  }
  func.func @transform_4(%arg0: i32, %arg1: i32) -> (i32, i32, i32, i32) {
    %c0_i32 = arith.constant 0 : i32
    %c0_i32_0 = arith.constant 0 : i32
    %c0_i32_1 = arith.constant 0 : i32
    return %arg0, %arg1, %c0_i32, %c0_i32_0 : i32, i32, i32, i32
  }
  func.func @transform_5(%arg0: i32, %arg1: i32) -> (i32, i32, i32, i32) {
    %c0_i32 = arith.constant 0 : i32
    %c0_i32_0 = arith.constant 0 : i32
    %c0_i32_1 = arith.constant 0 : i32
    return %arg0, %arg1, %c0_i32, %c0_i32_0 : i32, i32, i32, i32
  }
  func.func @transform_6(%arg0: i32, %arg1: i32) -> (i32, i32, i32, i32) {
    %c0_i32 = arith.constant 0 : i32
    %c0_i32_0 = arith.constant 0 : i32
    %c0_i32_1 = arith.constant 0 : i32
    %c0_i32_2 = arith.constant 0 : i32
    %c0_i32_3 = arith.constant 0 : i32
    return %c0_i32, %c0_i32_0, %c0_i32_1, %c0_i32_2 : i32, i32, i32, i32
  }
  func.func @transform_7(%arg0: i32, %arg1: i32) -> (i32, i32) {
    %c0_i32 = arith.constant 0 : i32
    %c0_i32_0 = arith.constant 0 : i32
    %c0_i32_1 = arith.constant 0 : i32
    return %c0_i32, %c0_i32_0 : i32, i32
  }
  func.func @transform_8(%arg0: i32, %arg1: i32) -> (i32, i32, i32, i32) {
    %c0_i32 = arith.constant 0 : i32
    %c0_i32_0 = arith.constant 0 : i32
    %c0_i32_1 = arith.constant 0 : i32
    return %arg0, %arg1, %c0_i32, %c0_i32_0 : i32, i32, i32, i32
  }
}

</mosaic_0001>

<bundles_post_ra>
// kernel: tpu_custom_call.1
= control target key start
LH: loop header
LB: loop body
LE: loop exit
PB: predicated region body
PF: predicated region fallthrough
CT: control target
= control target key end

     0   :  { %s2188_s27 = smov 0   ;;  %s2190_s28 = smov 0   ;;  %s2466_s0 = inlined_call_operand.vmem [shape: f32[2,9,9,4], index: 0, kind: input, shape index: {}]   ;;  %s2467_s1 = inlined_call_operand.vmem [shape: f32[2,9,9,4], index: 1, kind: input, shape index: {}]   ;;  %s2468_s2 = inlined_call_operand.vmem [shape: f32[2,9,9,4], index: 2, kind: input, shape index: {}]   ;;  %s2469_s3 = inlined_call_operand.vmem [shape: f32[2,9,9,4], index: 3, kind: input, shape index: {}]   ;;  %s2470_s4 = inlined_call_operand.vmem [shape: f32[2,8,9,4], index: 4, kind: input, shape index: {}]   ;;  %s2471_s5 = inlined_call_operand.vmem [shape: f32[2,8,9,4], index: 5, kind: input, shape index: {}]   ;;  %s2472_s6 = inlined_call_operand.vmem [shape: f32[3,3,4,4], index: 6, kind: input, shape index: {}]   ;;  %s2473_s7 = inlined_call_operand.vmem [shape: f32[1,4], index: 7, kind: input, shape index: {}]   ;;  %s2474_s8 = inlined_call_operand.vmem [shape: f32[2,8,8,4], index: 8, kind: output, shape index: {}]  }
   0x1   :  { %s2192_s29 = smov 0   ;;  %s2194_s30 = smov 0  }
   0x2   :  { %s2196_s9 = smov 0  }
   0x3 LB: > { %s27_s10 = sadd.s32 1, %s2133_s29  ;;  %s30_s11 = sadd.s32 1, %s2137_s30  ;;  %s2141_s9 = sphi %s2196_s9, %s18_s9   ;;  %s2137_s30 = sphi %s2194_s30, %s2479_s30   ;;  %s2133_s29 = sphi %s2192_s29, %s2478_s29   ;;  %s2129_s28 = sphi %s2190_s28, %s2477_s28   ;;  %s2125_s27 = sphi %s2188_s27, %s2476_s27  }
   0x4   : > { %p28_p0 = scmp.ge.s32.totalorder %s27_s10, 2  ;;  %p1815_p1 = scmp.ge.s32.totalorder %s2141_s9, 1 }
   0x5   : > { %p406_p2 = scmp.lt.s32.totalorder %s2141_s9, 5 }
   0x6   : > { %s2481_s10 = smov (%p28_p0, %s27_s10), 0  ;;  %s2483_s11 = smov (!%p28_p0, %s30_s11), %s2137_s30 }
   0x7   : > { %p407_p3 = pnand %p1815_p1, %p406_p2  ;;  %p32_p4 = scmp.ge.s32.totalorder %s2483_s11, 2 }
   0x8   : > { %v645_v0 = vld [vmem:[%s2472_s6] sm:$0xf] (!%p407_p3)  ;;  %vm659_vm0 = vcmask (!%p407_p3), 1043456   ;;  %v2224_v1 = vld [vmem:[%s2472_s6 + $0x10] sm:$0xf] (!%p407_p3)  ;;  %s2226_s16 = sshll.u32 (!%p407_p3), %s2125_s27, 2 }
   0x9   : > { %s2485_s11 = smov (%p32_p4, %s2483_s11), 0  ;;  %410 = sbr.rel (%p407_p3) target bundleno = 285 (0x11d), region = 52 }
   0xa   : > { %1952 = vmatprep.subr.msk.mxu1 (!%p407_p3), %vm659_vm0, %v645_v0  ;;  %1984 = vmatprep.subr.msk.mxu0 (!%p407_p3), %vm659_vm0, %v2224_v1  ;;  %p517_p5 = scmp.lt.s32.totalorder (!%p407_p3), %s2129_s28, 1  ;;  %p519_p6 = scmp.lt.s32.totalorder (!%p407_p3), %s2226_s16, 8  ;;  %v1845_v2 = vld [vmem:[%s2472_s6 + $0x4] sm:$0xf] (!%p407_p3)  ;;  %v1869_v3 = vld [vmem:[%s2472_s6 + $0x14] sm:$0xf] (!%p407_p3) }
   0xb   : > { %1953 = vmatpush3.msk.msra.mxu1 (!%p407_p3), %vm659_vm0, %v645_v0  ;;  %1985 = vmatpush3.msk.msra.mxu0 (!%p407_p3), %vm659_vm0, %v2224_v1  ;;  %p582_p7 = scmp.lt.s32.totalorder (!%p407_p3), %s2226_s16, 7  ;;  %vm646_vm1 = vcmask (!%p407_p3), 31744   ;;  %v1851_v7 = vld [vmem:[%s2472_s6 + $0x8] sm:$0xf] (!%p407_p3)  ;;  %v1875_v12 = vld [vmem:[%s2472_s6 + $0x18] sm:$0xf] (!%p407_p3) }
   0xc   : > { %1960 = vmatprep.subr.msk.mxu1 (!%p407_p3), %vm659_vm0, %v1845_v2  ;;  %1992 = vmatprep.subr.msk.mxu0 (!%p407_p3), %vm659_vm0, %v1869_v3  ;;  %vm862_vm2 = vcmask (!%p407_p3), 1046528   ;;  %v1857_v22 = vld [vmem:[%s2472_s6 + $0xc] sm:$0xf] (!%p407_p3)  ;;  %v1881_v49 = vld [vmem:[%s2472_s6 + $0x1c] sm:$0xf] (!%p407_p3) }
   0xd   : > { %v1887_v54 = vld [vmem:[%s2472_s6 + $0x20] sm:$0xf] (!%p407_p3) }
  0x10   : > { %s2487_s28 = smov (!%p517_p5, %s2129_s28), 1 }
  0x11   : > { %s520_s21 = scalar_select %p519_p6, %s2226_s16, 8 }
  0x12   : > { %s2062_s22 = smul.u32 18, %s2487_s28  ;;  %s1830_s13 = sshll.u32 %s2487_s28, 4 }
  0x13   : > { %s1817_s23 = sshll.u32 %s520_s21, 1  ;;  %s1904_s21 = sadd.s32 4, %s2226_s16 }
  0x14   : > { %s523_s24 = sadd.s32 %s2062_s22, %s1817_s23  ;;  %p2293_p8 = scmp.lt.s32.totalorder %s1904_s21, 8 }
  0x15   : > { %s1818_s25 = sshll.u32 %s523_s24, 3  ;;  %s1837_s27 = sshll.u32 %s2487_s28, 3 }
  0x16   : > { %s2253_s12 = scalar_lea.vmem %s2466_s0, %s1818_s25  ;;  %s2273_s18 = scalar_lea.vmem %s2468_s2, %s1818_s25 }
  0x17   : > { %v2257_v4 = vld [vmem:[%s2253_s12] sm:$0xff]  ;;  %s2260_s14 = scalar_select %p582_p7, %s2226_s16, 7  ;;  %v2263_v5 = vld [vmem:[%s2253_s12 + $0x10] sm:$0xff]  ;;  %v612_v9 = vld [vmem:[%s2253_s12 + $0x8] sm:$0x1] }
  0x18   : > { %v2266_v6 = vld [vmem:[%s2253_s12 + $0x20] sm:$0xff]  ;;  %1954 = vmatprep.mubr.msk.f32.mxu1 %vm646_vm1, %v2257_v4  ;;  %v2286_v8 = vld [vmem:[%s2253_s12 + $0x30] sm:$0xff]  ;;  %v863_v13 = vrot.slane %v2257_v4, 1  ;;  %v864_v17 = vrot.slane %v612_v9, 1  ;;  %v614_v26 = vld [vmem:[%s2253_s12 + $0x18] sm:$0x1] }
  0x19   : > { %s1829_s23 = sshll.u32 %s2260_s14, 1  ;;  %1955 = vmatmul.mubr.msk.f32.vlgmr.msra.gmra.mrb[0].mxu1 %vm646_vm1, %v2263_v5  ;;  %v619_v10 = vld [vmem:[%s2273_s18] sm:$0xff]  ;;  %v2308_v11 = vld [vmem:[%s2273_s18 + $0x10] sm:$0xff]  ;;  %v616_v30 = vld [vmem:[%s2253_s12 + $0x28] sm:$0x1]  ;;  %s2489_s21 = smov (!%p2293_p8, %s1904_s21), 8 }
  0x1a   : > { %s586_s24 = sadd.s32 %s1830_s13, %s1829_s23  ;;  %1961 = vmatpush3.msk.msra.mxu1 %vm659_vm0, %v1845_v2  ;;  %1957 = vmatprep.mubr.msk.f32.mxu1 %vm646_vm1, %v2266_v6  ;;  %v2341_v29 = vld [vmem:[%s2273_s18 + $0x20] sm:$0xff]  ;;  %v866_v36 = vrot.slane %v2263_v5, 1  ;;  %v622_v37 = vld [vmem:[%s2273_s18 + $0x30] sm:$0xff]  ;;  %v867_v38 = vrot.slane %v614_v26, 1  ;;  %v869_v39 = vrot.slane %v2266_v6, 1  ;;  %v865_v40 = vsel %vm862_vm2, %v863_v13, %v864_v17  ;;  %s1820_s16 = sshll.u32 %s2489_s21, 1 }
  0x1b   : > { %s1831_s25 = sshll.u32 %s586_s24, 3  ;;  %1968 = vmatprep.subr.msk.mxu1 %vm659_vm0, %v1851_v7  ;;  %v870_v41 = vrot.slane %v616_v30, 1  ;;  %v618_v42 = vld [vmem:[%s2253_s12 + $0x38] sm:$0x1]  ;;  %v872_v47 = vrot.slane %v2286_v8, 1  ;;  %s2381_s12 = sadd.s32 %s2062_s22, %s1820_s16 }
  0x1c   : > { %s2300_s13 = scalar_lea.vmem %s2470_s4, %s1831_s25  ;;  %s2305_s20 = scalar_lea.vmem %s2471_s5, %s1831_s25  ;;  %v868_v48 = vsel %vm862_vm2, %v866_v36, %v867_v38  ;;  %v873_v50 = vrot.slane %v618_v42, 1 }
  0x1d   : > { %v631_v14 = vld [vmem:[%s2305_s20] sm:$0xff]  ;;  %v632_v15 = vld [vmem:[%s2305_s20 + $0x10] sm:$0xff]  ;;  %1958 = vmatmul.mubr.msk.f32.gmra.mrb[2].mxu1 %vm646_vm1, %v2286_v8  ;;  %v624_v18 = vld [vmem:[%s2300_s13 + $0x8] sm:$0x1]  ;;  %v871_v51 = vsel %vm862_vm2, %v869_v39, %v870_v41  ;;  %s1821_s21 = sshll.u32 %s2381_s12, 3  ;;  %s607_s18 = sadd.s32 %s1837_s27, %s2260_s14 }
  0x1e   : > { %v2319_v16 = vld [vmem:[%s2300_s13] sm:$0xff]  ;;  %1986 = vmatprep.mubr.msk.f32.mxu0 %vm646_vm1, %v631_v14  ;;  %1962 = vmatprep.mubr.msk.f32.mxu1 %vm646_vm1, %v619_v10  ;;  %v2326_v20 = vld [vmem:[%s2300_s13 + $0x10] sm:$0xff]  ;;  %v626_v21 = vld [vmem:[%s2300_s13 + $0x18] sm:$0x1]  ;;  %v1194_v23 = vrot.slane %v624_v18, 1  ;;  %v874_v53 = vsel %vm862_vm2, %v872_v47, %v873_v50  ;;  %s576_s25 = scalar_lea.vmem %s2469_s3, %s1821_s21  ;;  %s1838_s26 = sshll.u32 %s607_s18, 3 }
  0x1f   : > { %v1193_v19 = vrot.slane %v2319_v16, 1  ;;  %1987 = vmatmul.mubr.msk.f32.vlgmr.msra.gmra.mrb[0].mxu0 %vm646_vm1, %v632_v15  ;;  %v2334_v24 = vld [vmem:[%s2300_s13 + $0x20] sm:$0xff]  ;;  %v628_v25 = vld [vmem:[%s2300_s13 + $0x28] sm:$0x1]  ;;  %v1196_v27 = vrot.slane %v2326_v20, 1  ;;  %v1197_v28 = vrot.slane %v626_v21, 1  ;;  %s609_s22 = scalar_lea.vmem %s2474_s8, %s1838_s26 }
  0x20   : > { %1993 = vmatpush3.msk.msra.mxu0 %vm659_vm0, %v1869_v3  ;;  %v1199_v32 = vrot.slane %v2334_v24, 1  ;;  %v1200_v33 = vrot.slane %v628_v25, 1  ;;  %v629_v34 = vld [vmem:[%s2300_s13 + $0x30] sm:$0xff]  ;;  %v630_v35 = vld [vmem:[%s2300_s13 + $0x38] sm:$0x1]  ;;  %s542_s13 = scalar_lea.vmem %s2467_s1, %s1821_s21  ;;  %v633_v56 = vld [vmem:[%s2305_s20 + $0x20] sm:$0xff] }
  0x21   : > { %v1195_v31 = vsel %vm862_vm2, %v1193_v19, %v1194_v23  ;;  %1963 = vmatmul.mubr.msk.f32.vlgmr.msra.gmra.mrb[0].mxu1 %vm646_vm1, %v2308_v11  ;;  %2000 = vmatprep.subr.msk.mxu0 %vm659_vm0, %v1875_v12  ;;  %v1198_v43 = vsel %vm862_vm2, %v1196_v27, %v1197_v28  ;;  %v1202_v44 = vrot.slane %v629_v34, 1  ;;  %v1203_v45 = vrot.slane %v630_v35, 1  ;;  %v635_v55 = vld [vmem:[%s542_s13] sm:$0xff]  ;;  %v636_v58 = vld [vmem:[%s542_s13 + $0x8] sm:$0x1]  ;;  %v634_v59 = vld [vmem:[%s2305_s20 + $0x30] sm:$0xff] }
  0x22   : > { %1994 = vmatprep.mubr.msk.f32.mxu0 %vm646_vm1, %v1195_v31  ;;  %1969 = vmatpush3.msk.msra.mxu1 %vm659_vm0, %v1851_v7  ;;  %v1201_v46 = vsel %vm862_vm2, %v1199_v32, %v1200_v33  ;;  %v637_v57 = vld [vmem:[%s576_s25] sm:$0xff]  ;;  %v1502_v60 = vrot.slane %v635_v55, 1  ;;  %v1503_v61 = vrot.slane %v636_v58, 1 }
  0x23   : > { %1965 = vmatprep.mubr.msk.f32.mxu1 %vm646_vm1, %v2341_v29  ;;  %1976 = vmatprep.subr.msk.mxu1 %vm659_vm0, %v1857_v22  ;;  %v1204_v52 = vsel %vm862_vm2, %v1202_v44, %v1203_v45 }
  0x24   : > { %v1504_v62 = vsel %vm862_vm2, %v1502_v60, %v1503_v61 }
  0x25   : > { %1966 = vmatmul.mubr.msk.f32.gmra.mrb[2].mxu1 %vm646_vm1, %v622_v37 }
  0x26   : > { %1970 = vmatprep.mubr.msk.f32.mxu1 %vm646_vm1, %v865_v40 }
  0x27   : > { %1995 = vmatmul.mubr.msk.f32.vlgmr.msra.gmra.mrb[0].mxu0 %vm646_vm1, %v1198_v43 }
  0x28   : > { %2001 = vmatpush3.msk.msra.mxu0 %vm659_vm0, %v1875_v12  ;;  %1997 = vmatprep.mubr.msk.f32.mxu0 %vm646_vm1, %v1201_v46 }
  0x29   : > { %1971 = vmatmul.mubr.msk.f32.vlgmr.msra.gmra.mrb[0].mxu1 %vm646_vm1, %v868_v48  ;;  %2008 = vmatprep.subr.msk.mxu0 %vm659_vm0, %v1881_v49 }
  0x2a   : > { %1977 = vmatpush3.msk.msra.mxu1 %vm659_vm0, %v1857_v22  ;;  %1973 = vmatprep.mubr.msk.f32.mxu1 %vm646_vm1, %v871_v51 }
  0x2b   : > { %1998 = vmatmul.mubr.msk.f32.gmra.mrb[2].mxu0 %vm646_vm1, %v1204_v52  ;;  %2024 = vmatprep.subr.msk.mxu1 %vm659_vm0, %v2224_v1 }
  0x2c   : > { %2002 = vmatprep.mubr.msk.f32.mxu0 %vm646_vm1, %v2263_v5 }
  0x2d   : > { %1974 = vmatmul.mubr.msk.f32.gmra.mrb[2].mxu1 %vm646_vm1, %v874_v53 }
  0x2e   : > { %1978 = vmatprep.mubr.msk.f32.mxu1 %vm646_vm1, %v2319_v16 }
  0x2f   : > { %2003 = vmatmul.mubr.msk.f32.vlgmr.msra.gmra.mrb[0].mxu0 %vm646_vm1, %v2266_v6 }
  0x30   : > { %2009 = vmatpush3.msk.msra.mxu0 %vm659_vm0, %v1881_v49  ;;  %2005 = vmatprep.mubr.msk.f32.mxu0 %vm646_vm1, %v2286_v8 }
  0x31   : > { %1979 = vmatmul.mubr.msk.f32.vlgmr.msra.gmra.mrb[0].mxu1 %vm646_vm1, %v2326_v20  ;;  %2016 = vmatprep.subr.msk.mxu0 %vm659_vm0, %v1887_v54 }
  0x32   : > { %2025 = vmatpush3.msk.msra.mxu1 %vm659_vm0, %v2224_v1  ;;  %1981 = vmatprep.mubr.msk.f32.mxu1 %vm646_vm1, %v2334_v24  ;;  %v1839_v1 = vld [vmem:[%s2473_s7] ss:$0 sm:$0xff] }
  0x33   : > { %2006 = vmatmul.mubr.msk.f32.gmra.mrb[2].mxu0 %vm646_vm1, %v635_v55 }
  0x34   : > { %2010 = vmatprep.mubr.msk.f32.mxu0 %vm646_vm1, %v2308_v11 }
  0x35   : > { %1982 = vmatmul.mubr.msk.f32.gmra.mrb[2].mxu1 %vm646_vm1, %v629_v34 }
  0x36   : > { %1989 = vmatprep.mubr.msk.f32.mxu1 %vm646_vm1, %v633_v56 }
  0x37   : > { %2011 = vmatmul.mubr.msk.f32.vlgmr.msra.gmra.mrb[0].mxu0 %vm646_vm1, %v2341_v29 }
  0x38   : > { %2017 = vmatpush3.msk.msra.mxu0 %vm659_vm0, %v1887_v54  ;;  %2013 = vmatprep.mubr.msk.f32.mxu0 %vm646_vm1, %v622_v37 }
  0x3b   : > { %2014 = vmatmul.mubr.msk.f32.gmra.mrb[2].mxu0 %vm646_vm1, %v637_v57 }
  0x3c   : > { %2018 = vmatprep.mubr.msk.f32.mxu0 %vm646_vm1, %v868_v48 }
  0x3d   : > { %1990 = vmatmul.mubr.msk.f32.vlgmr.msra.gmra.mrb[2].mxu1 %vm646_vm1, %v634_v59 }
  0x3f   : > { %2019 = vmatmul.mubr.msk.f32.vlgmr.msra.gmra.mrb[0].mxu0 %vm646_vm1, %v871_v51 }
  0x40   : > { %2021 = vmatprep.mubr.msk.f32.mxu0 %vm646_vm1, %v874_v53 }
  0x43   : > { %2022 = vmatmul.mubr.msk.f32.gmra.mrb[2].mxu0 %vm646_vm1, %v1504_v62 }
 0x104   : > { %v1980_v63 = vpop.f32.mrb[0].mxu1 }
 0x105   : > { %v1060_v0 = vpop.f32.mrb[1].mxu1  ;;  %v2026_v3 = vadd.f32 %v1980_v63, %v1839_v1 }
 0x106   : > { %v2028_v5 = vadd.f32 %v1839_v1, %v1060_v0 }
 0x110   : > { %v1991_v2 = vpop.f32.mrb[2].mxu1 }
 0x111   : > { %v1176_v4 = vpop.f32.mrb[3].mxu1  ;;  %v2030_v9 = vadd.f32 %v1991_v2, %v1839_v1 }
 0x112   : > { %v2020_v6 = vpop.f32.mrb[0].mxu0  ;;  %v2032_v11 = vadd.f32 %v1839_v1, %v1176_v4 }
 0x113   : > { %v2027_v7 = vadd.f32 %v2026_v3, %v2020_v6  ;;  %v1578_v8 = vpop.f32.mrb[1].mxu0 }
 0x114   : > { %v2029_v10 = vadd.f32 %v2028_v5, %v1578_v8 }
 0x115   : > { %v1602_v12 = vmax.f32 %v2027_v7, 0.0 }
 0x116   : > { %v1601_v13 = vmax.f32 %v2029_v10, 0.0  ;;  %v2023_v14 = vpop.f32.mrb[2].mxu0 }
 0x117   : > { %1606 = vst.msk [vmem:[%s609_s22 + $0x8] sm:$0xff] %vm646_vm1, %v1602_v12  ;;  %v2031_v15 = vadd.f32 %v2030_v9, %v2023_v14  ;;  %v1588_v16 = vpop.f32.mrb[3].mxu0 }
 0x118   : > { %1605 = vst.msk [vmem:[%s609_s22] sm:$0xff] %vm646_vm1, %v1601_v13  ;;  %v2033_v17 = vadd.f32 %v2032_v11, %v1588_v16 }
 0x119   : > { %v1604_v18 = vmax.f32 %v2031_v15, 0.0 }
 0x11a   : > { %v1603_v19 = vmax.f32 %v2033_v17, 0.0 }
 0x11b   : > { %1608 = vst.msk [vmem:[%s609_s22 + $0x18] sm:$0xff] %vm646_vm1, %v1604_v18 }
 0x11c   : > { %1607 = vst.msk [vmem:[%s609_s22 + $0x10] sm:$0xff] %vm646_vm1, %v1603_v19 }
 0x11d PF: > { %s18_s9 = sadd.s32 1, %s2141_s9   ;;  %s2476_s27 = smov %s2133_s29 }
 0x11e   : > { %p15_p9 = scmp.ge.s32.totalorder %s18_s9, 6   ;;  %s2477_s28 = smov %s2137_s30 }
 0x11f   : > { %s2478_s29 = smov %s2481_s10  ;;  %s2479_s30 = smov %s2485_s11 }
 0x120   :  { %17 = sbr.rel (!%p15_p9) target bundleno = 3 (0x3), region = 105 }

</bundles_post_ra>
